<compile_context>
chip_gen: v7x
topology: tpu7x:2x2x1
jax: 0.10.0
libtpu: 0.0.40
codegen_flags: <defaults>
</compile_context>

<pallas_src>
import functools

import jax
import jax.numpy as jnp
from jax.experimental import pallas as pl
from jax.experimental.pallas import tpu as pltpu

_LANE = 128


def _round_up(x, m):
    return (x + m - 1) // m * m


# --------------------------------------------------------------------------
# Kernels
# --------------------------------------------------------------------------
def _fm_kernel(e_ref, a_ref, o_ref, aug_ref, *, num_endms):
    """out_tile = E_aug @ [A ; A_i*A_j rows] (single MXU dot per tile)."""
    P = num_endms
    a = a_ref[...].astype(jnp.float32)
    aug_ref[0:P, :] = a                                   # linear rows
    r = P
    for i in range(P - 1):
        for j in range(i + 1, P):
            aug_ref[r:r + 1, :] = a[i:i + 1, :] * a[j:j + 1, :]
            r += 1
    o_ref[...] = jnp.dot(e_ref[...], aug_ref[...],
                         preferred_element_type=jnp.float32).astype(o_ref.dtype)


def _gbm_kernel(e_ref, a_ref, g_hbm, o_ref, aug_ref, gbuf, sems, *,
                num_endms, tile_n, n_pix, grid_n):
    """FM kernel + per-pair Gamma scaling.

    Gamma stays in HBM; only the P*(P-1)/2 rows actually used are DMA'd per
    tile (as P-1 contiguous row groups), not all P^2 rows.
    """
    P = num_endms
    step = pl.program_id(0)
    rem = n_pix - (grid_n - 1) * tile_n          # static width of last tile

    # For endmember i the needed Gamma rows i*P+j (j>i) form the contiguous
    # block [i*P+i+1, i*P+P) -> one rectangular DMA per i.
    groups = []
    off = 0
    for i in range(P - 1):
        cnt = P - 1 - i
        groups.append((i * P + i + 1, off, cnt))
        off += cnt

    def gamma_dma(width, do_start):
        col = step * tile_n
        for gi, (src_row, dst_row, cnt) in enumerate(groups):
            cp = pltpu.make_async_copy(
                g_hbm.at[pl.ds(src_row, cnt), pl.ds(col, width)],
                gbuf.at[pl.ds(dst_row, cnt), pl.ds(0, width)],
                sems.at[gi])
            if do_start:
                cp.start()
            else:
                cp.wait()

    def ragged(do_start):
        # Clamp the copy width on the ragged last tile (widths are static).
        if grid_n == 1:
            gamma_dma(rem, do_start)
        elif rem == tile_n:
            gamma_dma(tile_n, do_start)
        else:
            @pl.when(step < grid_n - 1)
            def _():
                gamma_dma(tile_n, do_start)

            @pl.when(step == grid_n - 1)
            def _():
                gamma_dma(rem, do_start)

    ragged(do_start=True)                        # issue Gamma DMAs first

    a = a_ref[...].astype(jnp.float32)
    aug_ref[0:P, :] = a                          # overlap with Gamma DMA

    ragged(do_start=False)                       # wait for Gamma rows
    g = gbuf[...].astype(jnp.float32)

    r = P
    pr = 0
    for i in range(P - 1):
        for j in range(i + 1, P):
            aug_ref[r:r + 1, :] = a[i:i + 1, :] * a[j:j + 1, :] * g[pr:pr + 1, :]
            r += 1
            pr += 1
    o_ref[...] = jnp.dot(e_ref[...], aug_ref[...],
                         preferred_element_type=jnp.float32).astype(o_ref.dtype)


# --------------------------------------------------------------------------
# Wrapper
# --------------------------------------------------------------------------
def _augment_endmembers(e2d, num_endms):
    # (B, P) -> (B, P + P*(P-1)/2) with extra columns E_i * E_j for i < j.
    cols = [e2d]
    for i in range(num_endms - 1):
        for j in range(i + 1, num_endms):
            cols.append((e2d[:, i] * e2d[:, j])[:, None])
    return jnp.concatenate(cols, axis=1) if len(cols) > 1 else e2d


def _vmem_capacity_bytes():
    try:
        cap = getattr(pltpu.get_tpu_info(), "vmem_capacity_bytes", None)
        if cap:
            return int(cap)
    except Exception:
        pass
    return 64 * 1024 * 1024     # v7x-safe fallback


def nonlinear_mixing_forward(inputs, nonlinear_model="FM", *, tile_n=None):
    """JAX/Pallas equivalent of Nonlinear_Mixing_layer_torch.forward."""
    if nonlinear_model == "FM":
        E, A = inputs
        Gamma = None
    elif nonlinear_model == "GBM":
        E, A, Gamma = inputs
    else:
        raise ValueError("nonlinear_model has no value: " + nonlinear_model)

    assert E.shape[0] == 1 and A.shape[0] == 1
    _, num_bands, num_endms = E.shape
    _, p_a, img_row, img_col = A.shape
    assert p_a == num_endms

    num_pairs = num_endms * (num_endms - 1) // 2
    # With zero pairs GBM degenerates to the purely linear path: Gamma unused.
    use_gamma = (nonlinear_model == "GBM") and num_pairs > 0
    k_aug = num_endms + num_pairs
    n_pix = img_row * img_col
    out_dtype = jnp.promote_types(E.dtype, A.dtype)

    # Free metadata reshapes only — no pads, casts or gathers over the big arrays.
    a2d = A[0].reshape(num_endms, n_pix)
    e2d = _augment_endmembers(E[0].astype(jnp.float32), num_endms)    # (B, k_aug)
    g2d = None
    if use_gamma:
        # TODO(synk): docstring claims Gamma=(1, P^2, no_Bands, no_Endms) but the
        # PyTorch code broadcasts Gamma[:, i*P+j] against (H, W) maps; we follow the code.
        g2d = Gamma[0].reshape(num_endms * num_endms, n_pix)

    a_item = jnp.dtype(a2d.dtype).itemsize
    o_item = jnp.dtype(out_dtype).itemsize
    g_item = jnp.dtype(g2d.dtype).itemsize if use_gamma else 0

    # ---- per-generation VMEM budget / tile sizing ------------------------
    vmem_cap = _vmem_capacity_bytes()
    vmem_limit = min(3 * vmem_cap // 4, 96 * 1024 * 1024)   # <=48 MiB on v7x
    budget = min(vmem_limit - 12 * 1024 * 1024, 64 * 1024 * 1024)
    fixed = 2 * num_bands * k_aug * 4 + (1 << 20)           # E buffers + headroom
    per_col = (2 * num_endms * a_item                       # A tile (double-buffered)
               + 2 * num_bands * o_item                     # out tile (double-buffered)
               + k_aug * 4                                  # aug scratch (f32)
               + (num_pairs * g_item if use_gamma else 0))  # Gamma scratch
    max_tile = max(_LANE, ((budget - fixed) // per_col) // _LANE * _LANE)

    if tile_n is None:
        # Largest lane-dense tile that fits, but keep >= 2 grid steps so both
        # v7x TensorCores share the "parallel" pixel axis.
        want = _round_up(pl.cdiv(n_pix, 2), _LANE) if n_pix > _LANE else _LANE
        tile_n = min(max_tile, want)
    else:
        tile_n = min(_round_up(tile_n, _LANE), max_tile, _round_up(n_pix, _LANE))
    tile_n = max(_LANE, tile_n)

    grid_n = pl.cdiv(n_pix, tile_n)

    e_spec = pl.BlockSpec((num_bands, k_aug), lambda n: (0, 0))
    a_spec = pl.BlockSpec((num_endms, tile_n), lambda n: (0, n))
    out_spec = pl.BlockSpec((num_bands, tile_n), lambda n: (0, n))
    out_shape = jax.ShapeDtypeStruct((num_bands, n_pix), out_dtype)

    bytes_accessed = (a2d.size * a_item + e2d.size * 4
                      + num_bands * n_pix * o_item
                      + (num_pairs * n_pix * g_item if use_gamma else 0))
    cost = pl.CostEstimate(flops=2 * num_bands * k_aug * n_pix,
                           transcendentals=0,
                           bytes_accessed=int(bytes_accessed))
    cparams = pltpu.CompilerParams(
        dimension_semantics=("parallel",),
        vmem_limit_bytes=int(vmem_limit))

    if use_gamma:
        out2d = pl.pallas_call(
            functools.partial(_gbm_kernel, num_endms=num_endms, tile_n=tile_n,
                              n_pix=n_pix, grid_n=grid_n),
            out_shape=out_shape,
            grid=(grid_n,),
            in_specs=[e_spec, a_spec, pl.BlockSpec(memory_space=pl.ANY)],
            out_specs=out_spec,
            scratch_shapes=[
                pltpu.VMEM((k_aug, tile_n), jnp.float32),       # augmented rows
                pltpu.VMEM((num_pairs, tile_n), g2d.dtype),     # Gamma pair rows
                pltpu.SemaphoreType.DMA((num_endms - 1,)),
            ],
            compiler_params=cparams,
            cost_estimate=cost,
        )(e2d, a2d, g2d)
    else:
        out2d = pl.pallas_call(
            functools.partial(_fm_kernel, num_endms=num_endms),
            out_shape=out_shape,
            grid=(grid_n,),
            in_specs=[e_spec, a_spec],
            out_specs=out_spec,
            scratch_shapes=[pltpu.VMEM((k_aug, tile_n), jnp.float32)],
            compiler_params=cparams,
            cost_estimate=cost,
        )(e2d, a2d)

    return out2d.reshape(1, num_bands, img_row, img_col)


# --------------------------------------------------------------------------
# Pure-JAX references
# --------------------------------------------------------------------------
def _reference_fm(E, A):
    lin = jnp.einsum("bp,phw->bhw", E[0], A[0])
    P = E.shape[-1]
    nonlin = jnp.zeros_like(lin)
    for i in range(P - 1):
        for j in range(i + 1, P):
            nonlin = nonlin + (E[0, :, i] * E[0, :, j])[:, None, None] * \
                              (A[0, i] * A[0, j])[None, :, :]
    return (lin + nonlin)[None]


def _reference_gbm(E, A, Gamma):
    lin = jnp.einsum("bp,phw->bhw", E[0], A[0])
    P = E.shape[-1]
    nonlin = jnp.zeros_like(lin)
    for i in range(P - 1):
        for j in range(i + 1, P):
            abu = A[0, i] * A[0, j] * Gamma[0, i * P + j]
            nonlin = nonlin + (E[0, :, i] * E[0, :, j])[:, None, None] * abu[None]
    return (lin + nonlin)[None]


# --------------------------------------------------------------------------
# Tests
# --------------------------------------------------------------------------
def _run_case(key, no_bands, no_endms, img_row, img_col, tile_n=None):
    k_e, k_a, k_g = jax.random.split(key, 3)
    E = jax.random.uniform(k_e, (1, no_bands, no_endms), dtype=jnp.float32)
    A = jax.nn.softmax(
        jax.random.normal(k_a, (1, no_endms, img_row, img_col), dtype=jnp.float32),
        axis=1)
    Gamma = jax.random.uniform(k_g, (1, no_endms ** 2, img_row, img_col),
                               dtype=jnp.float32)

    out_fm = jax.block_until_ready(
        nonlinear_mixing_forward([E, A], "FM", tile_n=tile_n))
    ref_fm = _reference_fm(E, A)
    assert out_fm.shape == (1, no_bands, img_row, img_col)
    assert jnp.allclose(out_fm, ref_fm, atol=1e-5, rtol=1e-5), "FM mismatch"

    out_gbm = jax.block_until_ready(
        nonlinear_mixing_forward([E, A, Gamma], "GBM", tile_n=tile_n))
    ref_gbm = _reference_gbm(E, A, Gamma)
    assert out_gbm.shape == (1, no_bands, img_row, img_col)
    assert jnp.allclose(out_gbm, ref_gbm, atol=1e-5, rtol=1e-5), "GBM mismatch"


if __name__ == "__main__":
    key = jax.random.PRNGKey(0)
    k0, k1, k2, k3 = jax.random.split(key, 4)

    # Case 1: canonical small shapes, auto tile -> 2 lane-dense grid steps.
    _run_case(k0, no_bands=8, no_endms=4, img_row=16, img_col=16)

    # Case 2: non-multiple-of-128 pixel count + forced small tile ->
    # multi-step grid with a ragged last block for both the auto-pipelined
    # streams and the manual Gamma DMA (partial-width copies).
    _run_case(k1, no_bands=8, no_endms=3, img_row=24, img_col=20, tile_n=128)

    # Case 3: P == 1 edge case (zero pairs; GBM degenerates to linear mixing).
    _run_case(k2, no_bands=8, no_endms=1, img_row=16, img_col=16)

    # Case 4: more pairs (P=5 -> 10 pair rows, 4 Gamma row groups) + ragged edge.
    _run_case(k3, no_bands=16, no_endms=5, img_row=20, img_col=12)

    print("KERNEL_OK")
</pallas_src>

<mosaic_0001>
module attributes {stable_mosaic.version = 11 : i64} {
  func.func @_fm_kernel(%arg0: i32, %arg1: memref<8x10xf32, #tpu.memory_space<vmem>>, %arg2: memref<4x128xf32, #tpu.memory_space<vmem>>, %arg3: memref<8x128xf32, #tpu.memory_space<vmem>>, %arg4: memref<10x128xf32, #tpu.memory_space<vmem>>) attributes {dimension_semantics = [#tpu.dimension_semantics<parallel>], iteration_bounds = array<i64: 2>, scalar_prefetch = 0 : i64, scratch_operands = 1 : i64, tpu.core_type = #tpu.core_type<tc>, window_params = [{pipeline_mode = #tpu.pipeline_mode<synchronous>, transform_indices = @transform_0, window_bounds = array<i64: 8, 10>}, {transform_indices = @transform_1, window_bounds = array<i64: 4, 128>}, {transform_indices = @transform_2, window_bounds = array<i64: 8, 128>}]} {
    %c0 = arith.constant 0 : index
    %c0_0 = arith.constant 0 : index
    %0 = vector.load %arg2[%c0, %c0_0] : memref<4x128xf32, #tpu.memory_space<vmem>>, vector<4x128xf32>
    %c0_1 = arith.constant 0 : index
    %c0_2 = arith.constant 0 : index
    %1 = vector.load %arg4[%c0_1, %c0_2] : memref<10x128xf32, #tpu.memory_space<vmem>>, vector<4x128xf32>
    tpu.vector_store %arg4[%c0_1, %c0_2], %0 {strides = array<i32>} : memref<10x128xf32, #tpu.memory_space<vmem>>, vector<4x128xf32>,
    %2 = vector.extract_strided_slice %0 {offsets = [0, 0], sizes = [1, 128], strides = [1, 1]} : vector<4x128xf32> to vector<1x128xf32>
    %3 = vector.extract_strided_slice %0 {offsets = [1, 0], sizes = [1, 128], strides = [1, 1]} : vector<4x128xf32> to vector<1x128xf32>
    %4 = arith.mulf %2, %3 : vector<1x128xf32>
    %c4 = arith.constant 4 : index
    %c0_3 = arith.constant 0 : index
    %5 = vector.load %arg4[%c4, %c0_3] : memref<10x128xf32, #tpu.memory_space<vmem>>, vector<1x128xf32>
    tpu.vector_store %arg4[%c4, %c0_3], %4 {strides = array<i32>} : memref<10x128xf32, #tpu.memory_space<vmem>>, vector<1x128xf32>,
    %6 = vector.extract_strided_slice %0 {offsets = [0, 0], sizes = [1, 128], strides = [1, 1]} : vector<4x128xf32> to vector<1x128xf32>
    %7 = vector.extract_strided_slice %0 {offsets = [2, 0], sizes = [1, 128], strides = [1, 1]} : vector<4x128xf32> to vector<1x128xf32>
    %8 = arith.mulf %6, %7 : vector<1x128xf32>
    %c5 = arith.constant 5 : index
    %c0_4 = arith.constant 0 : index
    %9 = vector.load %arg4[%c5, %c0_4] : memref<10x128xf32, #tpu.memory_space<vmem>>, vector<1x128xf32>
    tpu.vector_store %arg4[%c5, %c0_4], %8 {strides = array<i32>} : memref<10x128xf32, #tpu.memory_space<vmem>>, vector<1x128xf32>,
    %10 = vector.extract_strided_slice %0 {offsets = [0, 0], sizes = [1, 128], strides = [1, 1]} : vector<4x128xf32> to vector<1x128xf32>
    %11 = vector.extract_strided_slice %0 {offsets = [3, 0], sizes = [1, 128], strides = [1, 1]} : vector<4x128xf32> to vector<1x128xf32>
    %12 = arith.mulf %10, %11 : vector<1x128xf32>
    %c6 = arith.constant 6 : index
    %c0_5 = arith.constant 0 : index
    %13 = vector.load %arg4[%c6, %c0_5] : memref<10x128xf32, #tpu.memory_space<vmem>>, vector<1x128xf32>
    tpu.vector_store %arg4[%c6, %c0_5], %12 {strides = array<i32>} : memref<10x128xf32, #tpu.memory_space<vmem>>, vector<1x128xf32>,
    %14 = vector.extract_strided_slice %0 {offsets = [1, 0], sizes = [1, 128], strides = [1, 1]} : vector<4x128xf32> to vector<1x128xf32>
    %15 = vector.extract_strided_slice %0 {offsets = [2, 0], sizes = [1, 128], strides = [1, 1]} : vector<4x128xf32> to vector<1x128xf32>
    %16 = arith.mulf %14, %15 : vector<1x128xf32>
    %c7 = arith.constant 7 : index
    %c0_6 = arith.constant 0 : index
    %17 = vector.load %arg4[%c7, %c0_6] : memref<10x128xf32, #tpu.memory_space<vmem>>, vector<1x128xf32>
    tpu.vector_store %arg4[%c7, %c0_6], %16 {strides = array<i32>} : memref<10x128xf32, #tpu.memory_space<vmem>>, vector<1x128xf32>,
    %18 = vector.extract_strided_slice %0 {offsets = [1, 0], sizes = [1, 128], strides = [1, 1]} : vector<4x128xf32> to vector<1x128xf32>
    %19 = vector.extract_strided_slice %0 {offsets = [3, 0], sizes = [1, 128], strides = [1, 1]} : vector<4x128xf32> to vector<1x128xf32>
    %20 = arith.mulf %18, %19 : vector<1x128xf32>
    %c8 = arith.constant 8 : index
    %c0_7 = arith.constant 0 : index
    %21 = vector.load %arg4[%c8, %c0_7] : memref<10x128xf32, #tpu.memory_space<vmem>>, vector<1x128xf32>
    tpu.vector_store %arg4[%c8, %c0_7], %20 {strides = array<i32>} : memref<10x128xf32, #tpu.memory_space<vmem>>, vector<1x128xf32>,
    %22 = vector.extract_strided_slice %0 {offsets = [2, 0], sizes = [1, 128], strides = [1, 1]} : vector<4x128xf32> to vector<1x128xf32>
    %23 = vector.extract_strided_slice %0 {offsets = [3, 0], sizes = [1, 128], strides = [1, 1]} : vector<4x128xf32> to vector<1x128xf32>
    %24 = arith.mulf %22, %23 : vector<1x128xf32>
    %c9 = arith.constant 9 : index
    %c0_8 = arith.constant 0 : index
    %25 = vector.load %arg4[%c9, %c0_8] : memref<10x128xf32, #tpu.memory_space<vmem>>, vector<1x128xf32>
    tpu.vector_store %arg4[%c9, %c0_8], %24 {strides = array<i32>} : memref<10x128xf32, #tpu.memory_space<vmem>>, vector<1x128xf32>,
    %c0_9 = arith.constant 0 : index
    %c0_10 = arith.constant 0 : index
    %26 = vector.load %arg1[%c0_9, %c0_10] : memref<8x10xf32, #tpu.memory_space<vmem>>, vector<8x10xf32>
    %c0_11 = arith.constant 0 : index
    %c0_12 = arith.constant 0 : index
    %27 = vector.load %arg4[%c0_11, %c0_12] : memref<10x128xf32, #tpu.memory_space<vmem>>, vector<10x128xf32>
    %cst = arith.constant dense<0.000000e+00> : vector<8x128xf32>
    %28 = tpu.matmul %26, %27, %cst {dimension_numbers = #tpu.dot_dimension_numbers<[1], [0], [0], [1], [0, 0, 1, 1], [], []>} : vector<8x10xf32>, vector<10x128xf32>, vector<8x128xf32> -> vector<8x128xf32>
    %c0_13 = arith.constant 0 : index
    %c0_14 = arith.constant 0 : index
    %29 = vector.load %arg3[%c0_13, %c0_14] : memref<8x128xf32, #tpu.memory_space<vmem>>, vector<8x128xf32>
    tpu.vector_store %arg3[%c0_13, %c0_14], %28 {strides = array<i32>} : memref<8x128xf32, #tpu.memory_space<vmem>>, vector<8x128xf32>,
    return
  }
  func.func @transform_0(%arg0: i32) -> (i32, i32) {
    %c0_i32 = arith.constant 0 : i32
    %c0_i32_0 = arith.constant 0 : i32
    %c0_i32_1 = arith.constant 0 : i32
    return %c0_i32, %c0_i32_0 : i32, i32
  }
  func.func @transform_1(%arg0: i32) -> (i32, i32) {
    %c0_i32 = arith.constant 0 : i32
    %c0_i32_0 = arith.constant 0 : i32
    return %c0_i32, %arg0 : i32, i32
  }
  func.func @transform_2(%arg0: i32) -> (i32, i32) {
    %c0_i32 = arith.constant 0 : i32
    %c0_i32_0 = arith.constant 0 : i32
    return %c0_i32, %arg0 : i32, i32
  }
}

</mosaic_0001>

<bundles_post_ra>
// kernel: tpu_custom_call.1
= control target key start
LH: loop header
LB: loop body
LE: loop exit
PB: predicated region body
PF: predicated region fallthrough
CT: control target
= control target key end

     0   :  { %7 = vsyncpa [#allocation4], 0  ;;  %s813_s0 = inlined_call_operand.hbm [shape: f32[8,10], index: 0, kind: input, shape index: {}]   ;;  %s814_s1 = inlined_call_operand.hbm [shape: f32[4,256], index: 1, kind: input, shape index: {}]   ;;  %s815_s2 = inlined_call_operand.hbm [shape: f32[8,256], index: 2, kind: output, shape index: {}]  }
   0x1   :  { %8 = vsyncpa [#allocation7], 0 }
   0x2   :  { %10 = vsyncpa [#allocation7 + $0x1], 0 }
   0x3   :  { %11 = vsyncpa [#allocation5], 0 }
   0x4   :  { %13 = vsyncpa [#allocation5 + $0x1], 0  ;;  %s611_s9 = smov 0   ;;  %s613_s10 = smov 0  }
   0x5   :  { %s615_s11 = smov 0   ;;  %s617_s12 = smov 0  }
   0x6 LB: > { %s632_s13 = sadd.s32 4294967295, %s587_s12   ;;  %s368_s14 = sadd.s32 4294967294, %s587_s12   ;;  %s587_s12 = sphi %s617_s12, %s839_s12   ;;  %s583_s11 = sphi %s615_s11, %s838_s11   ;;  %s579_s10 = sphi %s613_s10, %s837_s10   ;;  %s575_s9 = sphi %s611_s9, %s836_s9  }
   0x7   : > { %p60_p0 = scmp.ne.s32.totalorder %s579_s10, %s575_s9  ;;  %p816_p1 = scmp.eq.s32.totalorder %s632_s13, 0 }
   0x8   : > { %p90_p3 = scmp.eq.s32.totalorder %s368_s14, 1  ;;  %p369_p5 = scmp.ge.s32.totalorder %s587_s12, 1 }
   0x9   : > { %p641_p4 = por %p816_p1, %p60_p0  ;;  %p97_p7 = scmp.lt.s32.totalorder %s587_s12, 3 }
   0xa   : > { %p646_p6 = por %p90_p3, %p60_p0  ;;  %s589_s18 = smov [#allocation3]  }
   0xb   : > { %s819_s15 = scalar_select %p641_p4, 1, 0 }
   0xc   : > { %s820_s16 = scalar_select %p646_p6, 1, 0 }
   0xd   : > { %p651_p8 = pnand %p369_p5, %p97_p7  ;;  %s110_s19 = sshll.u32 %s589_s18, 4  ;;  %s111_s19 = int_to_ptr.vmem [resolvable:$true] %s110_s19 }
   0xe   : > { %s659_s20 = sadd.s32 1, %s587_s12   ;;  %s47_s24 = sadd.s32 1, %s583_s11 }
   0xf   : > { %s821_s17 = scalar_select %p651_p8, 1, 0 }
  0x10   : > { %p406_p10 = pneg %p651_p8  ;;  %s44_s22 = ssub.s32 %s587_s12, %s659_s20 }
  0x11   : > { %p669_p12 = scmp.eq.s32.totalorder %s44_s22, 0  ;;  %s459_s27 = scalar_lea.hbm %s813_s0, 128 }
  0x12   : > { %p663_p11 = pnand %p406_p10, %p816_p1  ;;  %p460_p0 = scmp.ne.s32.totalorder %s813_s0, %s459_s27 }
  0x13   : > { %s823_s23 = scalar_select %p669_p12, 1, 0 }
  0x14   : > { %p461_p3 = pneg %p663_p11  ;;  %p466_p10 = scmp.lt.u32.totalorder %s459_s27, %s813_s0 }
  0x16   : > { %p462_p5 = pnand %p461_p3, %p460_p0 }
  0x18   : > { %p463_p7 = pneg %p462_p5 }
  0x1a   : > { %p468_p9 = pnand %p466_p10, %p463_p7 }
  0x1c   : > { %471 = shalt.err (!%p468_p9)
}
  0x1d   : > { %s472_s4 = scalar_lea.vmem %s111_s19, 128  ;;  %p480_p6 = scmp.lt.s32.totalorder %s111_s19, %s111_s19 }
  0x1e   : > { %p473_p1 = scmp.ne.s32.totalorder %s111_s19, %s472_s4  ;;  %p481_p4 = scmp.lt.s32.totalorder %s472_s4, %s472_s4 }
  0x20   : > { %p475_p2 = pnand %p473_p1, %p461_p3  ;;  %p482_p8 = por %p481_p4, %p480_p6 }
  0x22   : > { %p476_p13 = pneg %p475_p2 }
  0x24   : > { %p483_p12 = pnand %p482_p8, %p476_p13 }
  0x26   : > { %486 = shalt.err (!%p483_p12)
}
  0x27   : > { %409 = dma.hbm_to_vmem [thread:$0]  (!%p663_p11), %s813_s0, 128, %s111_s19, [#allocation4]  }
  0x28   : > { %p824_p1 = scmp.ne.s32.totalorder %s823_s23, 0  ;;  %p55_p2 = scmp.eq.s32.totalorder %s587_s12, 0 }
  0x29   : > { %p825_p4 = scmp.ne.s32.totalorder %s583_s11, %s579_s10  ;;  %p826_p6 = scmp.eq.s32.totalorder %s632_s13, 1 }
  0x2a   : > { %s695_s7 = scalar_select %p824_p1, %s583_s11, %s47_s24  }
  0x2b   : > { %p703_p8 = por %p826_p6, %p825_p4  ;;  %p419_p9 = scmp.lt.s32.totalorder %s587_s12, 2 }
  0x2c   : > { %s121_s14 = sand.u32 1, %s583_s11   ;;  %p828_p12 = pmov %p825_p4 }
  0x2d   : > { %s372_s18 = sshll.u32 %s121_s14, 2  ;;  %s373_s21 = sshll.u32 %s587_s12, 6 }
  0x2e   : > { %p56_p13 = por %p55_p2, %p828_p12  ;;  %s716_s19 = scalar_lea.hbm %s814_s1, %s373_s21 }
  0x2f   : > { %s125_s23 = scalar_lea.vmem [#allocation6], %s372_s18  ;;  %s122_s27 = scalar_lea.sflag [#allocation7], %s121_s14 }
  0x30   : > { %s132_s24 = sshll.u32 %s125_s23, 4  ;;  %p718_p11 = pnand %p419_p9, %p56_p13  ;;  %s722_s24 = int_to_ptr.vmem [resolvable:$true] %s132_s24 }
  0x31   : > { %s487_s28 = scalar_lea.hbm %s716_s19, 64  ;;  %s492_s3 = scalar_lea.hbm %s814_s1, 128 }
  0x32   : > { %p488_p0 = scmp.ne.s32.totalorder %s716_s19, %s487_s28  ;;  %p489_p3 = pneg %p718_p11 }
  0x33   : > { %p493_p10 = scmp.lt.u32.totalorder %s716_s19, %s814_s1  ;;  %p494_p1 = scmp.lt.u32.totalorder %s492_s3, %s487_s28 }
  0x34   : > { %p490_p5 = pnand %p489_p3, %p488_p0  ;;  %p496_p4 = scmp.lt.u32.totalorder %s487_s28, %s716_s19 }
  0x35   : > { %p495_p2 = por %p494_p1, %p493_p10 }
  0x36   : > { %p491_p7 = pneg %p490_p5 }
  0x37   : > { %p497_p6 = por %p496_p4, %p495_p2 }
  0x39   : > { %p498_p9 = pnand %p497_p6, %p491_p7 }
  0x3b   : > { %501 = shalt.err (!%p498_p9)
}
  0x3c   : > { %s502_s6 = scalar_lea.vmem %s722_s24, 64  ;;  %s590_s14 = smov [#allocation6]  }
  0x3d   : > { %p503_p12 = scmp.ne.s32.totalorder %s722_s24, %s502_s6  ;;  %s507_s18 = sshll.u32 %s590_s14, 4  ;;  %s508_s18 = int_to_ptr.vmem [resolvable:$false] %s507_s18 }
  0x3e   : > { %s509_s21 = scalar_lea.vmem %s508_s18, 128  ;;  %p510_p5 = scmp.lt.s32.totalorder %s722_s24, %s508_s18 }
  0x3f   : > { %p505_p13 = pnand %p503_p12, %p489_p3  ;;  %p511_p10 = scmp.lt.s32.totalorder %s509_s21, %s502_s6 }
  0x41   : > { %p506_p0 = pneg %p505_p13  ;;  %p512_p1 = por %p511_p10, %p510_p5 }
  0x43   : > { %p513_p2 = pnand %p512_p1, %p506_p0 }
  0x45   : > { %516 = shalt.err (!%p513_p2)
}
  0x46   : > { %413 = dma.hbm_to_vmem [thread:$0]  (!%p718_p11), %s716_s19, 64, %s722_s24, %s122_s27  }
  0x47   : > { %p830_p7 = scmp.ne.s32.totalorder %s821_s17, 0 }
  0x48   : > { %p831_p3 = scmp.eq.s32.totalorder (!%p830_p7), %s632_s13, 0 }
  0x49   : > { %141 = sbr.rel (%p830_p7) target bundleno = 331 (0x14b), region = 28 }
  0x50   : > { %562 = dma.done.wait (%p831_p3), [#allocation4], 128   ;;  %p832_p4 = pmov %p831_p3 }
  0x51   : > { %s756_s22 = sand.u32 1, %s579_s10   ;;  %p833_p6 = scmp.ne.s32.totalorder %s819_s15, 0 }
  0x52   : > { %564 = vsyncadd (%p832_p4), [#allocation4], 4294967168  ;;  %s376_s25 = sshll.u32 %s756_s22, 2  ;;  %s148_s23 = scalar_lea.sflag [#allocation7], %s756_s22 }
  0x53   : > { %s151_s26 = scalar_lea.vmem [#allocation6], %s376_s25 }
  0x54   : > { %566 = dma.done.wait (%p833_p6), %s148_s23, 64  }
  0x55   : > { %568 = vsyncadd (%p833_p6), %s148_s23, 4294967232  ;;  %v591_v0 = vmov 0.0|0.0   ;;  %vm592_vm0 = vmmov 0   ;;  %v593_v1 = vmov 0.0   ;;  %v172_v2 = vld [vmem:[%s151_s26] sm:$0xf] }
  0x56   : > { %394 = vmatprep.subr.bf16.mxu0 %v591_v0  ;;  %391 = vmatprep.mubr.msk.f32.mxu0 %vm592_vm0, %v593_v1  ;;  %173 = vst [vmem:[#allocation2] sm:$0xf] %v172_v2  ;;  %v175_v3 = vrot.slane %v172_v2, 1  ;;  %v179_v4 = vrot.slane %v172_v2, 2  ;;  %v183_v5 = vrot.slane %v172_v2, 3  ;;  %vm197_vm1 = vcmask 1041408  }
  0x57   : > { %vm594_vm2 = vmmov 1   ;;  %v190_v12 = vld [vmem:[#allocation3] sm:$0xff]  ;;  %vm193_vm4 = vcmask 80896   ;;  %s377_s15 = sshll.u32 %s756_s22, 3  ;;  %s381_s24 = sshll.u32 %s632_s13, 7 }
  0x58   : > { %v177_v6 = vmul.f32 %v175_v3, %v172_v2  ;;  %v181_v7 = vmul.f32 %v179_v4, %v172_v2  ;;  %v185_v8 = vmul.f32 %v183_v5, %v172_v2  ;;  %vm396_vm3 = vmpackc.low %vm197_vm1, %vm594_vm2  ;;  %s171_s17 = scalar_lea.vmem [#allocation8], %s377_s15  ;;  %s771_s29 = scalar_lea.hbm %s815_s2, %s381_s24 }
  0x59   : > { %s286_s19 = sshll.u32 %s171_s17, 4  ;;  %s273_s30 = scalar_lea.sflag [#allocation5], %s756_s22  ;;  %s766_s19 = int_to_ptr.vmem [resolvable:$true] %s286_s19 }
  0x5a   : > { %178 = vst [vmem:[#allocation2 + $0x4] sm:$0x1] %v177_v6  ;;  %182 = vst [vmem:[#allocation2 + $0x5] sm:$0x1] %v181_v7  ;;  %s517_s3 = scalar_lea.vmem %s766_s19, 128  ;;  %s595_s13 = smov [#allocation8]  }
  0x5b   : > { %186 = vst [vmem:[#allocation2 + $0x6] sm:$0x1] %v185_v8  ;;  %187 = vst [vmem:[#allocation2 + $0x6] sm:$0x2] %v177_v6  ;;  %p518_p11 = scmp.ne.s32.totalorder %s766_s19, %s517_s3  ;;  %s521_s4 = sshll.u32 %s595_s13, 4  ;;  %s522_s4 = int_to_ptr.vmem [resolvable:$false] %s521_s4 }
  0x5c   : > { %188 = vst [vmem:[#allocation2 + $0x7] sm:$0x2] %v181_v7  ;;  %189 = vst [vmem:[#allocation2 + $0x7] sm:$0x4] %v177_v6  ;;  %s523_s5 = scalar_lea.vmem %s522_s4, 256  ;;  %p524_p13 = scmp.lt.s32.totalorder %s766_s19, %s522_s4 }
  0x5d   : > { %p519_p9 = pnand %p518_p11, %p703_p8  ;;  %p525_p0 = scmp.lt.s32.totalorder %s523_s5, %s517_s3 }
  0x5f   : > { %p520_p12 = pneg %p519_p9  ;;  %p526_p5 = por %p525_p0, %p524_p13 }
  0x61   : > { %p527_p10 = pnand %p526_p5, %p520_p12 }
  0x62   : > { %v191_v9 = vld [vmem:[#allocation2] sm:$0xff] }
  0x63   : > { %v192_v10 = vld [vmem:[#allocation2 + $0x8] sm:$0x3] }
  0x64   : > { %v395_v11 = vpack.c.bf16 %v192_v10, %v191_v9 }
  0x66   : > { %397 = vmatpush3.bf16.msk.msra.mxu0 %vm396_vm3, %v395_v11 }
  0x69   : > { %392 = vmatmul.mubr.msk.f32.vlgmr.msra.gmra.mrb[0].mxu0 %vm193_vm4, %v190_v12 }
 0x13c   : > { %v267_v13 = vpop.f32.mrb[0].mxu0 }
 0x13d   : > { %271 = vst [vmem:[%s171_s17] sm:$0xff] %v267_v13  ;;  %v393_v14 = vpop.f32.mrb[1].mxu0 }
 0x13e   : > { %530 = shalt.err (!%p527_p10)
}
 0x13f   : > { %s531_s6 = scalar_lea.hbm %s771_s29, 128  ;;  %s535_s21 = scalar_lea.hbm %s815_s2, 256 }
 0x140   : > { %p532_p1 = scmp.ne.s32.totalorder %s771_s29, %s531_s6  ;;  %p536_p3 = scmp.lt.u32.totalorder %s771_s29, %s815_s2 }
 0x141   : > { %p537_p4 = scmp.lt.u32.totalorder %s535_s21, %s531_s6  ;;  %p539_p11 = scmp.lt.u32.totalorder %s531_s6, %s771_s29 }
 0x142   : > { %p533_p2 = pnand %p532_p1, %p703_p8 }
 0x143   : > { %p538_p6 = por %p537_p4, %p536_p3 }
 0x144   : > { %p534_p7 = pneg %p533_p2 }
 0x145   : > { %p540_p9 = por %p539_p11, %p538_p6 }
 0x147   : > { %p541_p12 = pnand %p540_p9, %p534_p7 }
 0x149   : > { %544 = shalt.err (!%p541_p12)
}
 0x14a   : > { %404 = dma.vmem_to_hbm [thread:$0]  (%p703_p8), %s766_s19, 128, %s771_s29, %s273_s30  }
 0x14b PF: > { %s298_s23 = sand.u32 1, %s575_s9   ;;  %p834_p13 = scmp.ne.s32.totalorder %s820_s16, 0 }
 0x14c   : > { %p835_p0 = scmp.ge.s32.totalorder %s587_s12, 2  ;;  %s299_s26 = scalar_lea.sflag [#allocation5], %s298_s23 }
 0x14e   : > { %p415_p5 = pnand %p835_p0, %p834_p13 }
 0x150   : > { %570 = dma.done.wait (!%p415_p5), %s299_s26, 128  }
 0x151   : > { %572 = vsyncadd (!%p415_p5), %s299_s26, 4294967168  ;;  %p16_p10 = scmp.ge.s32.totalorder %s659_s20, 4   ;;  %s836_s9 = smov %s579_s10 }
 0x152   : > { %s837_s10 = smov %s583_s11  ;;  %s838_s11 = smov %s695_s7 }
 0x153   : > { %s839_s12 = smov %s659_s20  ;;  %18 = sbr.rel (!%p16_p10) target bundleno = 6 (0x6), region = 78 }
 0x15a   :  { %304 = vsyncpa [#allocation4], 1 }
 0x15b   :  { %306 = vsyncpa [#allocation4 + $0x1], 1 }
 0x15c   :  { %307 = vsyncpa [#allocation7], 1 }
 0x15d   :  { %309 = vsyncpa [#allocation7 + $0x1], 1 }
 0x15e   :  { %310 = vsyncpa [#allocation5], 1 }
 0x15f   :  { %312 = vsyncpa [#allocation5 + $0x1], 1 }

</bundles_post_ra>
